<compile_context>
chip_gen: v5e
topology: v5e:2x2
jax: 0.10.0
libtpu: 0.0.40
codegen_flags: <defaults>
</compile_context>

<pallas_src>
import jax
import jax.numpy as jnp
from jax.experimental import pallas as pl
from jax.experimental.pallas import tpu as pltpu


# ----------------------------------------------------------------------------
# helpers
# ----------------------------------------------------------------------------
def _round_up(x, m):
    return ((x + m - 1) // m) * m


def _pad2(a, rows, cols):
    return jnp.pad(a, ((0, rows - a.shape[0]), (0, cols - a.shape[1])))


# ----------------------------------------------------------------------------
# Pallas kernels
# ----------------------------------------------------------------------------
def _mlp_kernel(x_ref, w1_ref, b1_ref, w2_ref, b2_ref, o_ref):
    """o = ReLU(x @ w1 + b1) @ w2 + b2 for one row tile (hidden stays on-chip)."""
    h = jnp.dot(x_ref[...], w1_ref[...], preferred_element_type=jnp.float32)
    h = jnp.maximum(h + b1_ref[...], 0.0)
    y = jnp.dot(h.astype(w2_ref.dtype), w2_ref[...],
                preferred_element_type=jnp.float32)
    o_ref[...] = (y + b2_ref[...]).astype(o_ref.dtype)


def _mlp_freq_kernel(x_ref, w1_ref, b1_ref, w2_ref, b2_ref, idx_ref, freq_ref,
                     o_ref):
    """Same as _mlp_kernel plus a fused frequency-bias row lookup.

    The gather freq_table[idx] is expressed as a one-hot MXU matmul
    (tile_n, T) @ (T, R) so it lowers robustly on all TPU generations.
    """
    h = jnp.dot(x_ref[...], w1_ref[...], preferred_element_type=jnp.float32)
    h = jnp.maximum(h + b1_ref[...], 0.0)
    y = jnp.dot(h.astype(w2_ref.dtype), w2_ref[...],
                preferred_element_type=jnp.float32)
    y = y + b2_ref[...]

    tile_n = idx_ref.shape[0]
    table_rows = freq_ref.shape[0]
    idx = idx_ref[...]                                           # (tile_n, 1)
    iota = jax.lax.broadcasted_iota(jnp.int32, (tile_n, table_rows), 1)
    onehot = (iota == idx).astype(jnp.float32)                   # (tile_n, T)
    fb = jnp.dot(onehot, freq_ref[...], preferred_element_type=jnp.float32)

    o_ref[...] = (y + fb).astype(o_ref.dtype)


# ----------------------------------------------------------------------------
# pallas_call wrappers
# ----------------------------------------------------------------------------
def fused_mlp(x, w1, b1, w2, b2, *, block_rows=256, compute_dtype=jnp.bfloat16):
    """ReLU(x @ w1 + b1) @ w2 + b2 as a single row-tiled Pallas kernel."""
    N, D = x.shape
    H = w1.shape[1]
    C = w2.shape[1]
    Dp, Hp, Cp = _round_up(D, 128), _round_up(H, 128), _round_up(C, 128)
    tile_n = min(block_rows, _round_up(N, 8))
    Np = _round_up(N, tile_n)

    x_p = _pad2(x, Np, Dp).astype(compute_dtype)
    w1_p = _pad2(w1, Dp, Hp).astype(compute_dtype)
    w2_p = _pad2(w2, Hp, Cp).astype(compute_dtype)
    b1_p = jnp.pad(b1, (0, Hp - H)).reshape(1, Hp).astype(jnp.float32)
    b2_p = jnp.pad(b2, (0, Cp - C)).reshape(1, Cp).astype(jnp.float32)

    out = pl.pallas_call(
        _mlp_kernel,
        out_shape=jax.ShapeDtypeStruct((Np, Cp), jnp.float32),
        grid_spec=pltpu.PrefetchScalarGridSpec(
            num_scalar_prefetch=0,
            grid=(Np // tile_n,),
            in_specs=[
                pl.BlockSpec((tile_n, Dp), lambda i: (i, 0)),
                pl.BlockSpec((Dp, Hp), lambda i: (0, 0)),
                pl.BlockSpec((1, Hp), lambda i: (0, 0)),
                pl.BlockSpec((Hp, Cp), lambda i: (0, 0)),
                pl.BlockSpec((1, Cp), lambda i: (0, 0)),
            ],
            out_specs=pl.BlockSpec((tile_n, Cp), lambda i: (i, 0)),
        ),
        compiler_params=pltpu.CompilerParams(
            dimension_semantics=("parallel",)),
    )(x_p, w1_p, b1_p, w2_p, b2_p)
    return out[:N, :C]


def fused_mlp_freq(x, w1, b1, w2, b2, flat_idx, freq_table, *,
                   block_rows=256, compute_dtype=jnp.bfloat16):
    """ReLU(x @ w1 + b1) @ w2 + b2 + freq_table[flat_idx], fully fused."""
    N, D = x.shape
    H = w1.shape[1]
    C = w2.shape[1]
    T = freq_table.shape[0]
    Dp, Hp, Cp = _round_up(D, 128), _round_up(H, 128), _round_up(C, 128)
    Tp = _round_up(T, 128)
    tile_n = min(block_rows, _round_up(N, 8))
    Np = _round_up(N, tile_n)

    x_p = _pad2(x, Np, Dp).astype(compute_dtype)
    w1_p = _pad2(w1, Dp, Hp).astype(compute_dtype)
    w2_p = _pad2(w2, Hp, Cp).astype(compute_dtype)
    b1_p = jnp.pad(b1, (0, Hp - H)).reshape(1, Hp).astype(jnp.float32)
    b2_p = jnp.pad(b2, (0, Cp - C)).reshape(1, Cp).astype(jnp.float32)
    freq_p = _pad2(freq_table, Tp, Cp).astype(jnp.float32)
    idx_p = jnp.pad(flat_idx.astype(jnp.int32), (0, Np - N)).reshape(Np, 1)

    out = pl.pallas_call(
        _mlp_freq_kernel,
        out_shape=jax.ShapeDtypeStruct((Np, Cp), jnp.float32),
        grid_spec=pltpu.PrefetchScalarGridSpec(
            num_scalar_prefetch=0,
            grid=(Np // tile_n,),
            in_specs=[
                pl.BlockSpec((tile_n, Dp), lambda i: (i, 0)),
                pl.BlockSpec((Dp, Hp), lambda i: (0, 0)),
                pl.BlockSpec((1, Hp), lambda i: (0, 0)),
                pl.BlockSpec((Hp, Cp), lambda i: (0, 0)),
                pl.BlockSpec((1, Cp), lambda i: (0, 0)),
                pl.BlockSpec((tile_n, 1), lambda i: (i, 0)),
                pl.BlockSpec((Tp, Cp), lambda i: (0, 0)),
            ],
            out_specs=pl.BlockSpec((tile_n, Cp), lambda i: (i, 0)),
        ),
        compiler_params=pltpu.CompilerParams(
            dimension_semantics=("parallel",)),
    )(x_p, w1_p, b1_p, w2_p, b2_p, idx_p, freq_p)
    return out[:N, :C]


# ----------------------------------------------------------------------------
# Predictor (parameters + forward), mirroring GPSNetPredictor
# ----------------------------------------------------------------------------
class GPSNetPredictorPallas:
    """JAX/Pallas re-implementation of GPSNetPredictor (inference path,
    mode='sgcls', use_obj_recls_logits=False, predict_use_bias=True)."""

    def __init__(self, key, in_channels, hidden_dim, num_obj_cls, num_rel_cls,
                 mode="sgcls"):
        self.in_channels = in_channels
        self.hidden_dim = hidden_dim
        self.num_obj_cls = num_obj_cls
        self.num_rel_cls = num_rel_cls
        self.mode = mode
        self.train_use_bias = True
        self.predict_use_bias = True
        self.use_obj_recls_logits = False
        self.obj_recls_logits_update_manner = "replace"
        self.training = False

        keys = jax.random.split(key, 9)
        s = 0.02
        # context-layer feature projections (stand-in for GPSNetContext output maps)
        self.w_ctx_obj = s * jax.random.normal(keys[0], (in_channels, hidden_dim), jnp.float32)
        self.b_ctx_obj = s * jax.random.normal(keys[1], (hidden_dim,), jnp.float32)
        self.w_ctx_rel = s * jax.random.normal(keys[2], (in_channels, hidden_dim), jnp.float32)
        self.b_ctx_rel = s * jax.random.normal(keys[3], (hidden_dim,), jnp.float32)
        # classifiers (build_classifier -> Linear)
        self.w_obj_cls = s * jax.random.normal(keys[4], (hidden_dim, num_obj_cls), jnp.float32)
        self.b_obj_cls = s * jax.random.normal(keys[5], (num_obj_cls,), jnp.float32)
        self.w_rel_cls = s * jax.random.normal(keys[6], (hidden_dim, num_rel_cls), jnp.float32)
        self.b_rel_cls = s * jax.random.normal(keys[7], (num_rel_cls,), jnp.float32)
        # FrequencyBias embedding table: (num_obj_cls * num_obj_cls, num_rel_cls)
        self.freq_table = s * jax.random.normal(
            keys[8], (num_obj_cls * num_obj_cls, num_rel_cls), jnp.float32)

        # debug handles for the demo
        self._refined_obj_logits = None
        self._flat_pair_idx = None

    # ---------------- forward ----------------
    def forward(self, inst_proposals, rel_pair_idxs, rel_labels, rel_binarys,
                roi_features, union_features, logger=None):
        num_objs = [int(p["labels"].shape[0]) for p in inst_proposals]
        num_rels = [int(r.shape[0]) for r in rel_pair_idxs]
        assert len(num_rels) == len(num_objs)

        # ----- refined object logits -----
        # TODO(synk): GPSNetContext message passing not reproduced; the context layer
        # is represented by its feature projection, fused with the classifier below.
        if self.mode == "predcls":
            obj_labels = jnp.concatenate([p["labels"] for p in inst_proposals], 0)
            refined_obj_logits = jax.nn.one_hot(
                obj_labels, self.num_obj_cls, dtype=jnp.float32)
        else:
            # fused: ReLU(roi @ W_ctx_obj + b) @ W_obj_cls + b  (one Pallas kernel)
            refined_obj_logits = fused_mlp(
                roi_features, self.w_ctx_obj, self.b_ctx_obj,
                self.w_obj_cls, self.b_obj_cls)
        self._refined_obj_logits = refined_obj_logits

        # obj_pred_logits: predict_logits from proposals (mode != predcls)
        if self.mode != "predcls":
            obj_pred_logits = jnp.concatenate(
                [p["predict_logits"] for p in inst_proposals], axis=0)
        else:
            obj_pred_logits = refined_obj_logits

        # use_obj_recls_logits == False -> labels straight from the proposals
        # TODO(synk): obj_prediction_nms branch (use_obj_recls_logits=True) not implemented.
        obj_pred_labels = jnp.concatenate(
            [p["labels"] for p in inst_proposals], axis=0)

        # ----- relation logits (+ fused frequency bias) -----
        use_freq_bias = (self.train_use_bias and self.training) or \
                        (self.predict_use_bias and not self.training)
        if use_freq_bias:
            # pair-label construction (JAX glue, per-image)
            obj_label_splits, start = [], 0
            for n in num_objs:
                obj_label_splits.append(obj_pred_labels[start:start + n])
                start += n
            pair_preds = []
            for pair_idx, obj_lab in zip(rel_pair_idxs, obj_label_splits):
                pair_preds.append(jnp.stack(
                    (obj_lab[pair_idx[:, 0]], obj_lab[pair_idx[:, 1]]), axis=1))
            pair_pred = jnp.concatenate(pair_preds, axis=0)
            flat_idx = pair_pred[:, 0].astype(jnp.int32) * self.num_obj_cls \
                + pair_pred[:, 1].astype(jnp.int32)
            self._flat_pair_idx = flat_idx

            # fused: ReLU(union @ W_ctx_rel + b) @ W_rel_cls + b + freq_table[flat_idx]
            rel_cls_logits = fused_mlp_freq(
                union_features, self.w_ctx_rel, self.b_ctx_rel,
                self.w_rel_cls, self.b_rel_cls, flat_idx, self.freq_table)
        else:
            rel_cls_logits = fused_mlp(
                union_features, self.w_ctx_rel, self.b_ctx_rel,
                self.w_rel_cls, self.b_rel_cls)

        # split per-image (matches torch .split(num_objs / num_rels, dim=0))
        obj_pred_logits_split, start = [], 0
        for n in num_objs:
            obj_pred_logits_split.append(obj_pred_logits[start:start + n])
            start += n
        rel_cls_logits_split, start = [], 0
        for n in num_rels:
            rel_cls_logits_split.append(rel_cls_logits[start:start + n])
            start += n

        add_losses = {}  # inference path
        return (obj_pred_logits_split, rel_cls_logits_split, add_losses, None, None)


# ----------------------------------------------------------------------------
# Demo
# ----------------------------------------------------------------------------
if __name__ == "__main__":
    key = jax.random.PRNGKey(0)
    k_params, k_roi, k_union, k_logits, k_labels, k_pairs = jax.random.split(key, 6)

    in_channels = 64
    hidden_dim = 32
    num_obj_cls = 16
    num_rel_cls = 16

    num_images = 2
    objs_per_img = 8
    rels_per_img = 16
    total_objs = num_images * objs_per_img
    total_rels = num_images * rels_per_img

    predictor = GPSNetPredictorPallas(
        k_params, in_channels, hidden_dim, num_obj_cls, num_rel_cls, mode="sgcls")

    roi_features = jax.random.normal(k_roi, (total_objs, in_channels), jnp.float32)
    union_features = jax.random.normal(k_union, (total_rels, in_channels), jnp.float32)

    predict_logits = jax.random.normal(
        k_logits, (total_objs, num_obj_cls), jnp.float32)
    labels = jax.random.randint(
        k_labels, (total_objs,), 0, num_obj_cls, dtype=jnp.int32)

    inst_proposals = []
    for i in range(num_images):
        sl = slice(i * objs_per_img, (i + 1) * objs_per_img)
        inst_proposals.append({
            "predict_logits": predict_logits[sl],
            "labels": labels[sl],
        })

    rel_pair_idxs = []
    pk = k_pairs
    for _ in range(num_images):
        pk, sub = jax.random.split(pk)
        rel_pair_idxs.append(
            jax.random.randint(sub, (rels_per_img, 2), 0, objs_per_img, dtype=jnp.int32))

    rel_labels = None
    rel_binarys = None

    out = predictor.forward(inst_proposals, rel_pair_idxs, rel_labels, rel_binarys,
                            roi_features, union_features)
    obj_logits_list, rel_logits_list, add_losses, pseudo, onehot = out

    for t in obj_logits_list + rel_logits_list:
        jax.block_until_ready(t)
    jax.block_until_ready(predictor._refined_obj_logits)

    # quick numerical sanity check of the fused relation kernel vs. plain JAX (f32)
    rel_logits = jnp.concatenate(rel_logits_list, axis=0)
    h_ref = jnp.maximum(union_features @ predictor.w_ctx_rel + predictor.b_ctx_rel, 0.0)
    rel_ref = h_ref @ predictor.w_rel_cls + predictor.b_rel_cls \
        + predictor.freq_table[predictor._flat_pair_idx]
    max_diff = float(jnp.max(jnp.abs(rel_logits - rel_ref)))
    assert max_diff < 5e-2, f"fused rel kernel mismatch: {max_diff}"

    assert len(obj_logits_list) == num_images
    assert len(rel_logits_list) == num_images
    assert obj_logits_list[0].shape == (objs_per_img, num_obj_cls)
    assert rel_logits_list[0].shape == (rels_per_img, num_rel_cls)
    assert predictor._refined_obj_logits.shape == (total_objs, num_obj_cls)
    assert add_losses == {} and pseudo is None and onehot is None

    print("KERNEL_OK")
</pallas_src>

<mosaic_0001>
module attributes {stable_mosaic.version = 11 : i64} {
  func.func @_mlp_kernel(%arg0: i32, %arg1: memref<16x128xbf16, #tpu.memory_space<vmem>>, %arg2: memref<128x128xbf16, #tpu.memory_space<vmem>>, %arg3: memref<1x128xf32, #tpu.memory_space<vmem>>, %arg4: memref<128x128xbf16, #tpu.memory_space<vmem>>, %arg5: memref<1x128xf32, #tpu.memory_space<vmem>>, %arg6: memref<16x128xf32, #tpu.memory_space<vmem>>) attributes {dimension_semantics = [#tpu.dimension_semantics<parallel>], iteration_bounds = array<i64: 1>, scalar_prefetch = 0 : i64, scratch_operands = 0 : i64, tpu.core_type = #tpu.core_type<tc>, window_params = [{transform_indices = @transform_0, window_bounds = array<i64: 16, 128>}, {pipeline_mode = #tpu.pipeline_mode<synchronous>, transform_indices = @transform_1, window_bounds = array<i64: 128, 128>}, {pipeline_mode = #tpu.pipeline_mode<synchronous>, transform_indices = @transform_2, window_bounds = array<i64: 1, 128>}, {pipeline_mode = #tpu.pipeline_mode<synchronous>, transform_indices = @transform_3, window_bounds = array<i64: 128, 128>}, {pipeline_mode = #tpu.pipeline_mode<synchronous>, transform_indices = @transform_4, window_bounds = array<i64: 1, 128>}, {transform_indices = @transform_5, window_bounds = array<i64: 16, 128>}]} {
    %c0 = arith.constant 0 : index
    %c0_0 = arith.constant 0 : index
    %0 = vector.load %arg1[%c0, %c0_0] : memref<16x128xbf16, #tpu.memory_space<vmem>>, vector<16x128xbf16>
    %c0_1 = arith.constant 0 : index
    %c0_2 = arith.constant 0 : index
    %1 = vector.load %arg2[%c0_1, %c0_2] : memref<128x128xbf16, #tpu.memory_space<vmem>>, vector<128x128xbf16>
    %cst = arith.constant dense<0.000000e+00> : vector<16x128xf32>
    %2 = tpu.matmul %0, %1, %cst {dimension_numbers = #tpu.dot_dimension_numbers<[1], [0], [0], [1], [0, 0, 1, 1], [], []>} : vector<16x128xbf16>, vector<128x128xbf16>, vector<16x128xf32> -> vector<16x128xf32>
    %c0_3 = arith.constant 0 : index
    %c0_4 = arith.constant 0 : index
    %3 = vector.load %arg3[%c0_3, %c0_4] : memref<1x128xf32, #tpu.memory_space<vmem>>, vector<1x128xf32>
    %4 = vector.broadcast %3 : vector<1x128xf32> to vector<16x128xf32>
    %5 = arith.addf %2, %4 : vector<16x128xf32>
    %cst_5 = arith.constant 0.000000e+00 : f32
    %6 = vector.broadcast %cst_5 : f32 to vector<16x128xf32>
    %7 = arith.maximumf %5, %6 : vector<16x128xf32>
    %8 = arith.truncf %7 : vector<16x128xf32> to vector<16x128xbf16>
    %c0_6 = arith.constant 0 : index
    %c0_7 = arith.constant 0 : index
    %9 = vector.load %arg4[%c0_6, %c0_7] : memref<128x128xbf16, #tpu.memory_space<vmem>>, vector<128x128xbf16>
    %cst_8 = arith.constant dense<0.000000e+00> : vector<16x128xf32>
    %10 = tpu.matmul %8, %9, %cst_8 {dimension_numbers = #tpu.dot_dimension_numbers<[1], [0], [0], [1], [0, 0, 1, 1], [], []>} : vector<16x128xbf16>, vector<128x128xbf16>, vector<16x128xf32> -> vector<16x128xf32>
    %c0_9 = arith.constant 0 : index
    %c0_10 = arith.constant 0 : index
    %11 = vector.load %arg5[%c0_9, %c0_10] : memref<1x128xf32, #tpu.memory_space<vmem>>, vector<1x128xf32>
    %12 = vector.broadcast %11 : vector<1x128xf32> to vector<16x128xf32>
    %13 = arith.addf %10, %12 : vector<16x128xf32>
    %c0_11 = arith.constant 0 : index
    %c0_12 = arith.constant 0 : index
    %14 = vector.load %arg6[%c0_11, %c0_12] : memref<16x128xf32, #tpu.memory_space<vmem>>, vector<16x128xf32>
    tpu.vector_store %arg6[%c0_11, %c0_12], %13 {strides = array<i32>} : memref<16x128xf32, #tpu.memory_space<vmem>>, vector<16x128xf32>,
    return
  }
  func.func @transform_0(%arg0: i32) -> (i32, i32) {
    %c0_i32 = arith.constant 0 : i32
    %c0_i32_0 = arith.constant 0 : i32
    return %arg0, %c0_i32 : i32, i32
  }
  func.func @transform_1(%arg0: i32) -> (i32, i32) {
    %c0_i32 = arith.constant 0 : i32
    %c0_i32_0 = arith.constant 0 : i32
    %c0_i32_1 = arith.constant 0 : i32
    return %c0_i32, %c0_i32_0 : i32, i32
  }
  func.func @transform_2(%arg0: i32) -> (i32, i32) {
    %c0_i32 = arith.constant 0 : i32
    %c0_i32_0 = arith.constant 0 : i32
    %c0_i32_1 = arith.constant 0 : i32
    return %c0_i32, %c0_i32_0 : i32, i32
  }
  func.func @transform_3(%arg0: i32) -> (i32, i32) {
    %c0_i32 = arith.constant 0 : i32
    %c0_i32_0 = arith.constant 0 : i32
    %c0_i32_1 = arith.constant 0 : i32
    return %c0_i32, %c0_i32_0 : i32, i32
  }
  func.func @transform_4(%arg0: i32) -> (i32, i32) {
    %c0_i32 = arith.constant 0 : i32
    %c0_i32_0 = arith.constant 0 : i32
    %c0_i32_1 = arith.constant 0 : i32
    return %c0_i32, %c0_i32_0 : i32, i32
  }
  func.func @transform_5(%arg0: i32) -> (i32, i32) {
    %c0_i32 = arith.constant 0 : i32
    %c0_i32_0 = arith.constant 0 : i32
    return %arg0, %c0_i32 : i32, i32
  }
}

</mosaic_0001>

<bundles_post_ra>
// kernel: tpu_custom_call.1
= control target key start
LH: loop header
LB: loop body
LE: loop exit
PB: predicated region body
PF: predicated region fallthrough
CT: control target
= control target key end

     0   :  { %10 = vsyncpa [#allocation3], 0  ;;  %s518_s0 = inlined_call_operand.hbm [shape: bf16[16,128], index: 0, kind: input, shape index: {}]   ;;  %s519_s1 = inlined_call_operand.hbm [shape: bf16[128,128], index: 1, kind: input, shape index: {}]   ;;  %s520_s2 = inlined_call_operand.vmem [shape: f32[1,128], index: 2, kind: input, shape index: {}]   ;;  %s521_s3 = inlined_call_operand.hbm [shape: bf16[128,128], index: 3, kind: input, shape index: {}]   ;;  %s522_s4 = inlined_call_operand.vmem [shape: f32[1,128], index: 4, kind: input, shape index: {}]   ;;  %s523_s5 = inlined_call_operand.hbm [shape: f32[16,128], index: 5, kind: output, shape index: {}]  }
   0x1   :  { %11 = vsyncpa [#allocation6], 0 }
   0x2   :  { %12 = vsyncpa [#allocation4], 0  ;;  %s30_s20 = sshll.u32 %s519_s1, 4  ;;  %s462_s21 = smov [#allocation5]   ;;  %s31_s20 = int_to_ptr.hbm [resolvable:$true] %s30_s20 }
   0x3   :  { %s32_s22 = sshll.u32 %s462_s21, 4  ;;  %s17_s25 = sshll.u32 %s518_s0, 4  ;;  %s33_s22 = int_to_ptr.vmem [resolvable:$true] %s32_s22  ;;  %s18_s25 = int_to_ptr.hbm [resolvable:$true] %s17_s25 }
   0x4   :  { %s463_s26 = smov 64   ;;  %s464_s27 = smov 4  }
   0x5   :  { %38 = dma.hbm_to_vmem [thread:$0]  %s31_s20, 1024, %s33_s22, [#allocation6], %s463_s26, %s463_s26, %s464_s27  }
   0x6   :  { %s465_s28 = smov [#allocation2]   ;;  %s45_s7 = sshll.u32 %s521_s3, 4  ;;  %s46_s7 = int_to_ptr.hbm [resolvable:$true] %s45_s7 }
   0x7   :  { %s19_s29 = sshll.u32 %s465_s28, 4  ;;  %s466_s1 = smov [#allocation7]   ;;  %s20_s29 = int_to_ptr.vmem [resolvable:$true] %s19_s29 }
   0x8   :  { %25 = dma.hbm_to_vmem [thread:$0]  %s18_s25, 128, %s20_s29, [#allocation3], %s463_s26, %s463_s26, %s464_s27  }
   0x9   :  { %s47_s8 = sshll.u32 %s466_s1, 4  ;;  %s48_s8 = int_to_ptr.vmem [resolvable:$true] %s47_s8 }
   0xa   :  { %53 = dma.hbm_to_vmem [thread:$0]  %s46_s7, 1024, %s48_s8, [#allocation6], %s463_s26, %s463_s26, %s464_s27  }
   0xb   :  { %456 = dma.done.wait [#allocation3], 128  }
   0xc   :  { %457 = vsyncadd [#allocation3], 4294967168 }
   0xd   :  { %458 = dma.done.wait [#allocation6], 2048  }
   0xe   :  { %459 = vsyncadd [#allocation6], 4294965248  ;;  %v341_v0 = vld [vmem:[#allocation5 + $0x38] sm:$0xff]  ;;  %v340_v1 = vld [vmem:[#allocation5 + $0x30] sm:$0xff]  ;;  %s467_s11 = smov [#allocation8]   ;;  %s468_s15 = smov 128  }
   0xf   :  { %144 = vmatpush.bf16.msra.mxu0 %v341_v0  ;;  %v349_v2 = vld [vmem:[#allocation7 + $0x38] sm:$0xff]  ;;  %v348_v3 = vld [vmem:[#allocation7 + $0x30] sm:$0xff]  ;;  %v339_v4 = vld [vmem:[#allocation5 + $0x28] sm:$0xff]  ;;  %s249_s12 = sshll.u32 %s467_s11, 4  ;;  %s469_s16 = smov 8   ;;  %s250_s12 = int_to_ptr.vmem [resolvable:$true] %s249_s12 }
  0x10   :  { %229 = vmatpush.bf16.msra.mxu1 %v349_v2  ;;  %v347_v5 = vld [vmem:[#allocation7 + $0x28] sm:$0xff]  ;;  %v338_v6 = vld [vmem:[#allocation5 + $0x20] sm:$0xff]  ;;  %v337_v8 = vld [vmem:[#allocation5 + $0x18] sm:$0xff] }
  0x11   :  { %v346_v7 = vld [vmem:[#allocation7 + $0x20] sm:$0xff]  ;;  %v336_v9 = vld [vmem:[#allocation5 + $0x10] sm:$0xff]  ;;  %v335_v10 = vld [vmem:[#allocation5 + $0x8] sm:$0xff] }
  0x12   :  { %v334_v11 = vld [vmem:[#allocation5] sm:$0xff]  ;;  %v333_v12 = vld [vmem:[#allocation2] sm:$0xff]  ;;  %v344_v14 = vld [vmem:[#allocation7 + $0x10] sm:$0xff] }
  0x13   :  { %145 = vmatpush.bf16.msra.mxu0 %v340_v1  ;;  %v345_v13 = vld [vmem:[#allocation7 + $0x18] sm:$0xff]  ;;  %v343_v15 = vld [vmem:[#allocation7 + $0x8] sm:$0xff]  ;;  %v342_v16 = vld [vmem:[#allocation7] sm:$0xff] }
  0x14   :  { %230 = vmatpush.bf16.msra.mxu1 %v348_v3  ;;  %v358_v18 = vld [vmem:[%s520_s2] ss:$0 sm:$0xff]  ;;  %s251_s2 = sshll.u32 %s523_s5, 4  ;;  %s252_s2 = int_to_ptr.hbm [resolvable:$true] %s251_s2 }
  0x15   :  { %v359_v25 = vld [vmem:[%s522_s4] ss:$0 sm:$0xff] }
  0x17   :  { %146 = vmatpush.bf16.msra.mxu0 %v339_v4 }
  0x18   :  { %231 = vmatpush.bf16.msra.mxu1 %v347_v5 }
  0x1b   :  { %147 = vmatpush.bf16.msra.mxu0 %v338_v6 }
  0x1c   :  { %232 = vmatpush.bf16.msra.mxu1 %v346_v7 }
  0x1f   :  { %148 = vmatpush.bf16.msra.mxu0 %v337_v8 }
  0x20   :  { %233 = vmatpush.bf16.msra.mxu1 %v345_v13 }
  0x23   :  { %149 = vmatpush.bf16.msra.mxu0 %v336_v9 }
  0x24   :  { %234 = vmatpush.bf16.msra.mxu1 %v344_v14 }
  0x27   :  { %150 = vmatpush.bf16.msra.mxu0 %v335_v10 }
  0x28   :  { %235 = vmatpush.bf16.msra.mxu1 %v343_v15 }
  0x2b   :  { %151 = vmatpush.bf16.msra.mxu0 %v334_v11 }
  0x2c   :  { %236 = vmatpush.bf16.msra.mxu1 %v342_v16 }
  0x2e   :  { %152 = vmatmul.bf16.vlgmr.msra.gmra.mxu0 %v333_v12 }
  0xab   :  { %v153_v17 = vpop.f32.mrf.mxu0 }
  0xac   :  { %v154_v19 = vadd.f32 %v358_v18, %v153_v17 }
  0xae   :  { %v158_v22 = vmax.f32 %v154_v19, 0.0 }
  0xb3   :  { %v155_v20 = vpop.f32.mrf.mxu0 }
  0xb4   :  { %v156_v21 = vadd.f32 %v358_v18, %v155_v20 }
  0xb6   :  { %v159_v23 = vmax.f32 %v156_v21, 0.0 }
  0xb8   :  { %v160_v24 = vpack.c.bf16 %v159_v23, %v158_v22 }
  0xba   :  { %237 = vmatmul.bf16.vlgmr.msra.gmra.mxu1 %v160_v24 }
 0x137   :  { %v238_v26 = vpop.f32.mrf.mxu1 }
 0x138   :  { %v239_v27 = vadd.f32 %v359_v25, %v238_v26 }
 0x13a   :  { %243 = vst [vmem:[#allocation8] sm:$0xff] %v239_v27 }
 0x13f   :  { %v240_v28 = vpop.f32.mrf.mxu1 }
 0x140   :  { %v241_v29 = vadd.f32 %v359_v25, %v240_v28 }
 0x142   :  { %244 = vst [vmem:[#allocation8 + $0x8] sm:$0xff] %v241_v29 }
 0x143   :  { %257 = dma.vmem_to_hbm [thread:$0]  %s250_s12, 256, %s252_s2, [#allocation4], %s468_s15, %s468_s15, %s469_s16  }
 0x144   :  { %460 = dma.done.wait [#allocation4], 256  }
 0x145   :  { %461 = vsyncadd [#allocation4], 4294967040 }
 0x146   :  { %262 = vsyncpa [#allocation3], 1 }
 0x147   :  { %263 = vsyncpa [#allocation6], 1 }
 0x148   :  { %264 = vsyncpa [#allocation4], 1 }

</bundles_post_ra>
